<compile_context>
chip_gen: v7x
topology: tpu7x:2x2x1
jax: 0.10.0
libtpu: 0.0.40
codegen_flags: <defaults>
</compile_context>

<pallas_src>
import jax
import jax.numpy as jnp
from jax import lax
from jax.experimental import pallas as pl
from jax.experimental.pallas import tpu as pltpu

IN_F, HID_F, OUT_F = 10, 16, 2


def _mlp_kernel(x_ref, w1_ref, b1_ref, w2_ref, b2_ref, o_ref):
    """x_ref: (TB, IN_F) natural row-major tile straight from HBM.

    Everything downstream is feature-major with the batch on the lane axis,
    so both matmul results and the output store are lane-dense.
    """
    x = x_ref[...]                                           # (TB, IN_F)
    # h[m, b] = sum_k w1[m, k] * x[b, k]  -> (HID_F, TB).  The transposed-RHS
    # contraction folds the layout change into the MXU op — no wrapper
    # transpose, no separate XLU transpose of a [10, B] copy of x.
    h = lax.dot_general(w1_ref[...], x, (((1,), (1,)), ((), ())),
                        preferred_element_type=jnp.float32)
    h = jnp.maximum(h + b1_ref[...], 0.0)                    # bias + ReLU on the VPU
    out = jnp.dot(w2_ref[...], h,
                  preferred_element_type=jnp.float32) + b2_ref[...]
    o_ref[...] = out.astype(o_ref.dtype)                     # (OUT_F, TB) lane-dense store


def _round_up(a, m):
    return ((a + m - 1) // m) * m


def _physical_vmem_bytes():
    """Per-core physical VMEM (128 MiB on v5e/v6e, 64 MiB on v7x).

    Falls back to the smallest (v7x) value if the query is unavailable so the
    derived tile size is safe on every generation.
    """
    try:
        return int(pltpu.get_tpu_info().vmem_capacity_bytes)
    except Exception:
        return 64 << 20


# VMEM bytes consumed per row of the batch tile:
#   x tile (TB, 10)  lane-pads to (TB, 128) -> 512 B/row, double-buffered
#   out tile (2, TB) sublane-pads to (8, TB) ->  32 B/row, double-buffered
#   + headroom for the h/out intermediates and any in-body relayout.
_VMEM_BYTES_PER_ROW = 2 * 512 + 2 * 32 + 576


def neural_net_forward(x, w1, b1, w2, b2, *, block_b=32768):
    """x: [B, 10] f32. w1: [16, 10], b1: [16], w2: [2, 16], b2: [2]
    (PyTorch nn.Linear layout). Returns [B, 2] f32, same semantics as the
    PyTorch module in eval mode."""
    B, in_f = x.shape
    assert in_f == IN_F, x.shape

    # ---- batch-tile sizing --------------------------------------------------
    # TB is always a multiple of 128 (lane width of the (OUT_F, TB) output
    # tile); a ragged last block (masked writeback) handles B % TB != 0.
    budget = max(16 << 20, min(_physical_vmem_bytes() - (8 << 20), 96 << 20))
    tb_vmem = max(128, ((budget - (4 << 20)) // _VMEM_BYTES_PER_ROW) // 128 * 128)
    tb_batch = _round_up(max(B, 1), 128)               # never bigger than needed
    tb_split = _round_up(pl.cdiv(max(B, 1), 2), 128)   # keep grid_b >= 2 for v7x's 2 TCs
    TB = max(128, min(_round_up(block_b, 128), tb_batch, tb_split, tb_vmem))
    grid_b = pl.cdiv(B, TB)

    b1_c = b1.reshape(HID_F, 1).astype(jnp.float32)
    b2_c = b2.reshape(OUT_F, 1).astype(jnp.float32)

    cost = pl.CostEstimate(
        flops=2 * B * (IN_F * HID_F + HID_F * OUT_F),
        transcendentals=0,
        bytes_accessed=4 * B * (IN_F + OUT_F)
        + 4 * (IN_F * HID_F + HID_F * OUT_F + HID_F + OUT_F),
    )

    out_fm = pl.pallas_call(
        _mlp_kernel,
        out_shape=jax.ShapeDtypeStruct((OUT_F, B), jnp.float32),
        grid=(grid_b,),
        in_specs=[
            pl.BlockSpec((TB, IN_F), lambda i: (i, 0)),      # x streams in, natural layout
            pl.BlockSpec((HID_F, IN_F), lambda i: (0, 0)),   # weights/biases VMEM-resident
            pl.BlockSpec((HID_F, 1), lambda i: (0, 0)),
            pl.BlockSpec((OUT_F, HID_F), lambda i: (0, 0)),
            pl.BlockSpec((OUT_F, 1), lambda i: (0, 0)),
        ],
        out_specs=pl.BlockSpec((OUT_F, TB), lambda i: (0, i)),
        compiler_params=pltpu.CompilerParams(
            dimension_semantics=("parallel",),   # v7x: shard the batch grid over both TCs
            vmem_limit_bytes=int(budget),        # v5e's 16 MiB scoped default is too small
        ),
        cost_estimate=cost,
    )(x.astype(jnp.float32), w1.astype(jnp.float32), b1_c,
      w2.astype(jnp.float32), b2_c)

    # Only remaining layout plumbing (~16 B/row vs the kernel's ~48 B/row); it
    # exists solely because the module's contract is a [B, 2] output.  A
    # feature-major [2, B] op boundary would remove it entirely.
    return out_fm.T


def init_params(key):
    """Deterministic init mimicking torch.nn.Linear defaults
    (U[-1/sqrt(fan_in), +1/sqrt(fan_in)]), stored in PyTorch [out, in] layout."""
    k1, k2, k3, k4 = jax.random.split(key, 4)
    bound1 = 1.0 / jnp.sqrt(float(IN_F))
    bound2 = 1.0 / jnp.sqrt(float(HID_F))
    w1 = jax.random.uniform(k1, (HID_F, IN_F), jnp.float32, -bound1, bound1)
    b1 = jax.random.uniform(k2, (HID_F,), jnp.float32, -bound1, bound1)
    w2 = jax.random.uniform(k3, (OUT_F, HID_F), jnp.float32, -bound2, bound2)
    b2 = jax.random.uniform(k4, (OUT_F,), jnp.float32, -bound2, bound2)
    return w1, b1, w2, b2


def _reference(x, w1, b1, w2, b2):
    h = jnp.maximum(x @ w1.T + b1, 0.0)
    return h @ w2.T + b2


if __name__ == "__main__":
    key = jax.random.PRNGKey(0)
    kx, kp, kx2 = jax.random.split(key, 3)
    w1, b1, w2, b2 = init_params(kp)

    # Small primary check (matches the module's expected usage).
    batch = 8
    x = jax.random.normal(kx, (batch, IN_F), jnp.float32)
    out = jax.block_until_ready(neural_net_forward(x, w1, b1, w2, b2))
    ref = _reference(x, w1, b1, w2, b2)
    assert out.shape == (batch, OUT_F), out.shape
    assert jnp.allclose(out, ref, atol=1e-5, rtol=1e-5), "mismatch vs JAX reference (small batch)"

    # Secondary check exercising multi-tile grid + ragged (masked) last block.
    batch2 = 2348  # not a multiple of 128, >1 tile when block_b=1024
    x2 = jax.random.normal(kx2, (batch2, IN_F), jnp.float32)
    out2 = jax.block_until_ready(neural_net_forward(x2, w1, b1, w2, b2, block_b=1024))
    ref2 = _reference(x2, w1, b1, w2, b2)
    assert out2.shape == (batch2, OUT_F), out2.shape
    assert jnp.allclose(out2, ref2, atol=1e-5, rtol=1e-5), "mismatch vs JAX reference (tiled batch)"

    print("KERNEL_OK")
</pallas_src>

<mosaic_0001>
module attributes {stable_mosaic.version = 11 : i64} {
  func.func @_mlp_kernel(%arg0: i32, %arg1: memref<128x10xf32, #tpu.memory_space<vmem>>, %arg2: memref<16x10xf32, #tpu.memory_space<vmem>>, %arg3: memref<16x1xf32, #tpu.memory_space<vmem>>, %arg4: memref<2x16xf32, #tpu.memory_space<vmem>>, %arg5: memref<2x1xf32, #tpu.memory_space<vmem>>, %arg6: memref<2x128xf32, #tpu.memory_space<vmem>>) attributes {dimension_semantics = [#tpu.dimension_semantics<parallel>], iteration_bounds = array<i64: 1>, scalar_prefetch = 0 : i64, scratch_operands = 0 : i64, tpu.core_type = #tpu.core_type<tc>, window_params = [{transform_indices = @transform_0, window_bounds = array<i64: 128, 10>}, {pipeline_mode = #tpu.pipeline_mode<synchronous>, transform_indices = @transform_1, window_bounds = array<i64: 16, 10>}, {pipeline_mode = #tpu.pipeline_mode<synchronous>, transform_indices = @transform_2, window_bounds = array<i64: 16, 1>}, {pipeline_mode = #tpu.pipeline_mode<synchronous>, transform_indices = @transform_3, window_bounds = array<i64: 2, 16>}, {pipeline_mode = #tpu.pipeline_mode<synchronous>, transform_indices = @transform_4, window_bounds = array<i64: 2, 1>}, {transform_indices = @transform_5, window_bounds = array<i64: 2, 128>}]} {
    %c0 = arith.constant 0 : index
    %c0_0 = arith.constant 0 : index
    %0 = vector.load %arg1[%c0, %c0_0] : memref<128x10xf32, #tpu.memory_space<vmem>>, vector<128x10xf32>
    %c0_1 = arith.constant 0 : index
    %c0_2 = arith.constant 0 : index
    %1 = vector.load %arg2[%c0_1, %c0_2] : memref<16x10xf32, #tpu.memory_space<vmem>>, vector<16x10xf32>
    %cst = arith.constant dense<0.000000e+00> : vector<16x128xf32>
    %2 = tpu.matmul %1, %0, %cst {dimension_numbers = #tpu.dot_dimension_numbers<[1], [1], [0], [0], [0, 0, 1, 0], [], []>} : vector<16x10xf32>, vector<128x10xf32>, vector<16x128xf32> -> vector<16x128xf32>
    %c0_3 = arith.constant 0 : index
    %c0_4 = arith.constant 0 : index
    %3 = vector.load %arg3[%c0_3, %c0_4] : memref<16x1xf32, #tpu.memory_space<vmem>>, vector<16x1xf32>
    %4 = vector.broadcast %3 : vector<16x1xf32> to vector<16x128xf32>
    %5 = arith.addf %2, %4 : vector<16x128xf32>
    %cst_5 = arith.constant 0.000000e+00 : f32
    %6 = vector.broadcast %cst_5 : f32 to vector<16x128xf32>
    %7 = arith.maximumf %5, %6 : vector<16x128xf32>
    %c0_6 = arith.constant 0 : index
    %c0_7 = arith.constant 0 : index
    %8 = vector.load %arg4[%c0_6, %c0_7] : memref<2x16xf32, #tpu.memory_space<vmem>>, vector<2x16xf32>
    %cst_8 = arith.constant dense<0.000000e+00> : vector<2x128xf32>
    %9 = tpu.matmul %8, %7, %cst_8 {dimension_numbers = #tpu.dot_dimension_numbers<[1], [0], [0], [1], [0, 0, 1, 1], [], []>} : vector<2x16xf32>, vector<16x128xf32>, vector<2x128xf32> -> vector<2x128xf32>
    %c0_9 = arith.constant 0 : index
    %c0_10 = arith.constant 0 : index
    %10 = vector.load %arg5[%c0_9, %c0_10] : memref<2x1xf32, #tpu.memory_space<vmem>>, vector<2x1xf32>
    %11 = vector.broadcast %10 : vector<2x1xf32> to vector<2x128xf32>
    %12 = arith.addf %9, %11 : vector<2x128xf32>
    %c0_11 = arith.constant 0 : index
    %c0_12 = arith.constant 0 : index
    %13 = vector.load %arg6[%c0_11, %c0_12] : memref<2x128xf32, #tpu.memory_space<vmem>>, vector<2x128xf32>
    tpu.vector_store %arg6[%c0_11, %c0_12], %12 {strides = array<i32>} : memref<2x128xf32, #tpu.memory_space<vmem>>, vector<2x128xf32>,
    return
  }
  func.func @transform_0(%arg0: i32) -> (i32, i32) {
    %c0_i32 = arith.constant 0 : i32
    %c0_i32_0 = arith.constant 0 : i32
    return %arg0, %c0_i32 : i32, i32
  }
  func.func @transform_1(%arg0: i32) -> (i32, i32) {
    %c0_i32 = arith.constant 0 : i32
    %c0_i32_0 = arith.constant 0 : i32
    %c0_i32_1 = arith.constant 0 : i32
    return %c0_i32, %c0_i32_0 : i32, i32
  }
  func.func @transform_2(%arg0: i32) -> (i32, i32) {
    %c0_i32 = arith.constant 0 : i32
    %c0_i32_0 = arith.constant 0 : i32
    %c0_i32_1 = arith.constant 0 : i32
    return %c0_i32, %c0_i32_0 : i32, i32
  }
  func.func @transform_3(%arg0: i32) -> (i32, i32) {
    %c0_i32 = arith.constant 0 : i32
    %c0_i32_0 = arith.constant 0 : i32
    %c0_i32_1 = arith.constant 0 : i32
    return %c0_i32, %c0_i32_0 : i32, i32
  }
  func.func @transform_4(%arg0: i32) -> (i32, i32) {
    %c0_i32 = arith.constant 0 : i32
    %c0_i32_0 = arith.constant 0 : i32
    %c0_i32_1 = arith.constant 0 : i32
    return %c0_i32, %c0_i32_0 : i32, i32
  }
  func.func @transform_5(%arg0: i32) -> (i32, i32) {
    %c0_i32 = arith.constant 0 : i32
    %c0_i32_0 = arith.constant 0 : i32
    return %c0_i32, %arg0 : i32, i32
  }
}

</mosaic_0001>

<bundles_post_ra>
// kernel: tpu_custom_call.1
= control target key start
LH: loop header
LB: loop body
LE: loop exit
PB: predicated region body
PF: predicated region fallthrough
CT: control target
= control target key end

     0   :  { %vm51_vm0 = vcmask 80896   ;;  %v443_v6 = vmov 0   ;;  %s596_s0 = inlined_call_operand.vmem [shape: f32[8,10], index: 0, kind: input, shape index: {}]   ;;  %s597_s1 = inlined_call_operand.vmem [shape: f32[16,10], index: 1, kind: input, shape index: {}]   ;;  %s598_s2 = inlined_call_operand.vmem [shape: f32[16,1], index: 2, kind: input, shape index: {}]   ;;  %s599_s3 = inlined_call_operand.vmem [shape: f32[2,16], index: 3, kind: input, shape index: {}]   ;;  %s600_s4 = inlined_call_operand.vmem [shape: f32[2,1], index: 4, kind: input, shape index: {}]   ;;  %s601_s5 = inlined_call_operand.hbm [shape: f32[2,8], index: 5, kind: output, shape index: {}]  }
   0x1   :  { %v21_v0 = vld [vmem:[%s596_s0] sm:$0xff]  ;;  %v22_v1 = vld [vmem:[%s596_s0 + $0x8] sm:$0xff]  ;;  %v23_v2 = vld [vmem:[%s596_s0 + $0x10] sm:$0xff]  ;;  %417 = vset.pattern.permute.xlu0 %v443_v6  ;;  %418 = vset.pattern.permute.xlu1 %v443_v6 }
   0x2   :  { %v361_v3 = vpack.c.bf16 %v22_v1, %v21_v0  ;;  %vm489_vm1 = vmpackc.low %vm51_vm0, %vm51_vm0  ;;  %v24_v5 = vld [vmem:[%s596_s0 + $0x18] sm:$0xff]  ;;  %v37_v8 = vld [vmem:[%s597_s1] sm:$0xff] }
   0x3   :  { %v367_v7 = vpack.c.bf16 %v24_v5, %v23_v2  ;;  %v25_v9 = vld [vmem:[%s596_s0 + $0x20] sm:$0xff]  ;;  %v26_v10 = vld [vmem:[%s596_s0 + $0x28] sm:$0xff]  ;;  %351 = vmatprep.mubr.msk.f32.mxu0 %vm51_vm0, %v37_v8 }
   0x4   :  { %363 = vmatprep.subr.msk.bf16.mxu0 %vm489_vm1, %v361_v3  ;;  %v39_v11 = vld [vmem:[%s598_s2] sm:$0xff] }
   0x5   :  { %366 = vmatpush3.bf16.xpose.msk.msra.mxu0 %vm489_vm1, %v361_v3  ;;  %43 = vperm.xlu0 %417, %v39_v11  }
   0x6   :  { %369 = vmatprep.subr.msk.bf16.mxu0 %vm489_vm1, %v367_v7 }
   0x7   :  { %10 = vsyncpa [#allocation3], 0  ;;  %v40_v12 = vld [vmem:[%s598_s2 + $0x8] sm:$0xff]  ;;  %v373_v13 = vpack.c.bf16 %v26_v10, %v25_v9  ;;  %v27_v14 = vld [vmem:[%s596_s0 + $0x30] sm:$0xff]  ;;  %v444_v30 = vmov 0.0|0.0   ;;  %vm445_vm2 = vmmov 0  }
   0x8   :  { %v28_v15 = vld [vmem:[%s596_s0 + $0x38] sm:$0xff]  ;;  %v29_v17 = vld [vmem:[%s596_s0 + $0x40] sm:$0xff]  ;;  %v30_v18 = vld [vmem:[%s596_s0 + $0x48] sm:$0xff]  ;;  %409 = vmatprep.subr.bf16.mxu1 %v444_v30  ;;  %v446_v31 = vmov 0.0   ;;  %vm190_vm3 = vcmask 130048   ;;  %s447_s9 = smov [#allocation2]  }
   0x9   :  { %48 = vperm.xlu0 %417, %v40_v12   ;;  %v379_v16 = vpack.c.bf16 %v28_v15, %v27_v14  ;;  %v385_v19 = vpack.c.bf16 %v30_v18, %v29_v17  ;;  %v31_v20 = vld [vmem:[%s596_s0 + $0x50] sm:$0xff]  ;;  %v32_v21 = vld [vmem:[%s596_s0 + $0x58] sm:$0xff]  ;;  %v33_v23 = vld [vmem:[%s596_s0 + $0x60] sm:$0xff]  ;;  %358 = vmatprep.mubr.msk.f32.mxu1 %vm445_vm2, %v446_v31 }
   0xa   :  { %v391_v22 = vpack.c.bf16 %v32_v21, %v31_v20  ;;  %v34_v24 = vld [vmem:[%s596_s0 + $0x68] sm:$0xff]  ;;  %v35_v26 = vld [vmem:[%s596_s0 + $0x70] sm:$0xff]  ;;  %v36_v27 = vld [vmem:[%s596_s0 + $0x78] sm:$0xff] }
   0xb   :  { %v397_v25 = vpack.c.bf16 %v34_v24, %v33_v23  ;;  %v403_v28 = vpack.c.bf16 %v36_v27, %v35_v26  ;;  %v38_v29 = vld [vmem:[%s597_s1 + $0x8] sm:$0xff]  ;;  %v184_v32 = vld [vmem:[%s600_s4] sm:$0x3]  ;;  %s271_s4 = sshll.u32 %s447_s9, 4  ;;  %s272_s4 = int_to_ptr.vmem [resolvable:$true] %s271_s4 }
   0xc   :  { %187 = vperm.xlu1 %418, %v184_v32   ;;  %v183_v42 = vld [vmem:[%s599_s3] sm:$0x3]  ;;  %s419_s10 = scalar_lea.vmem %s272_s4, 32  ;;  %p424_p1 = scmp.lt.s32.totalorder %s272_s4, %s272_s4 }
   0xd   :  { %372 = vmatpush3.bf16.xpose.msk.msra.mxu0 %vm489_vm1, %v367_v7  ;;  %p420_p0 = scmp.ne.s32.totalorder %s272_s4, %s419_s10  ;;  %p425_p2 = scmp.lt.s32.totalorder %s419_s10, %s419_s10 }
   0xe   :  { %375 = vmatprep.subr.msk.bf16.mxu0 %vm489_vm1, %v373_v13 }
   0xf   :  { %p426_p3 = por %p425_p2, %p424_p1 }
  0x11   :  { %p427_p4 = pnand %p426_p3, %p420_p0 }
  0x15   :  { %378 = vmatpush3.bf16.xpose.msk.msra.mxu0 %vm489_vm1, %v373_v13 }
  0x16   :  { %381 = vmatprep.subr.msk.bf16.mxu0 %vm489_vm1, %v379_v16 }
  0x1d   :  { %384 = vmatpush3.bf16.xpose.msk.msra.mxu0 %vm489_vm1, %v379_v16 }
  0x1e   :  { %387 = vmatprep.subr.msk.bf16.mxu0 %vm489_vm1, %v385_v19 }
  0x25   :  { %390 = vmatpush3.bf16.xpose.msk.msra.mxu0 %vm489_vm1, %v385_v19 }
  0x26   :  { %393 = vmatprep.subr.msk.bf16.mxu0 %vm489_vm1, %v391_v22 }
  0x2d   :  { %396 = vmatpush3.bf16.xpose.msk.msra.mxu0 %vm489_vm1, %v391_v22 }
  0x2e   :  { %399 = vmatprep.subr.msk.bf16.mxu0 %vm489_vm1, %v397_v25 }
  0x35   :  { %402 = vmatpush3.bf16.xpose.msk.msra.mxu0 %vm489_vm1, %v397_v25 }
  0x36   :  { %405 = vmatprep.subr.msk.bf16.mxu0 %vm489_vm1, %v403_v28 }
  0x3d   :  { %408 = vmatpush3.bf16.xpose.msk.msra.mxu0 %vm489_vm1, %v403_v28 }
  0x44   :  { %352 = vmatmul.mubr.msk.f32.vlgmr.msra.gmra.mrb[0].mxu0 %vm51_vm0, %v38_v29 }
  0x84   :  { %v44_v33 = vpop.permute.xlu0 %43 }
  0x88   :  { %v49_v34 = vpop.permute.xlu0 %48 }
  0x8b   :  { %v188_v43 = vpop.permute.xlu1 %187 }
 0x117   :  { %v353_v35 = vpop.f32.mrb[0].mxu0 }
 0x118   :  { %v178_v36 = vadd.f32 %v353_v35, %v49_v34  ;;  %v172_v37 = vpop.f32.mrb[1].mxu0 }
 0x119   :  { %v173_v38 = vadd.f32 %v172_v37, %v44_v33 }
 0x11a   :  { %v182_v39 = vmax.f32 %v178_v36, 0.0 }
 0x11b   :  { %v181_v40 = vmax.f32 %v173_v38, 0.0 }
 0x11d   :  { %v410_v41 = vpack.c.bf16 %v182_v39, %v181_v40 }
 0x11f   :  { %411 = vmatpush3.bf16.msra.mxu1 %v410_v41 }
 0x122   :  { %359 = vmatmul.mubr.msk.f32.vlgmr.msra.gmra.mrb[0].mxu1 %vm190_vm3, %v183_v42 }
 0x1f5   :  { %v260_v44 = vpop.f32.mrb[0].mxu1 }
 0x1f6   :  { %v261_v45 = vadd.f32 %v260_v44, %v188_v43  ;;  %v360_v46 = vpop.f32.mrb[1].mxu1 }
 0x1f8   :  { %264 = vst [vmem:[#allocation2] sm:$0x3] %v261_v45 }
 0x1f9   :  { %430 = shalt.err (!%p427_p4)
}
 0x1fa   :  { %s431_s3 = scalar_lea.hbm %s601_s5, 32 }
 0x1fb   :  { %p432_p5 = scmp.ne.s32.totalorder %s601_s5, %s431_s3  ;;  %p435_p6 = scmp.lt.u32.totalorder %s431_s3, %s601_s5 }
 0x1fd   :  { %p437_p7 = pnand %p435_p6, %p432_p5 }
 0x1ff   :  { %440 = shalt.err (!%p437_p7)
}
 0x200   :  { %274 = dma.vmem_to_hbm [thread:$0]  %s272_s4, 32, %s601_s5, [#allocation3]  }
 0x201   :  { %441 = dma.done.wait [#allocation3], 32  }
 0x202   :  { %442 = vsyncadd [#allocation3], 4294967264 }
 0x203   :  { %278 = vsyncpa [#allocation3], 1 }

</bundles_post_ra>
